<compile_context>
chip_gen: v6e
topology: v6e:2x2x1
jax: 0.10.0
libtpu: 0.0.40
codegen_flags: <defaults>
</compile_context>

<pallas_src>
import functools

import jax
import jax.numpy as jnp
from jax import lax
from jax.experimental import pallas as pl
from jax.experimental.pallas import tpu as pltpu


def _mha_wrapper_kernel(x_ref, wqkv_ref, o_ref, *, num_heads, d_out):
    """One batch element per grid step; all heads computed with batched matmuls.

    x_ref:    (1, S, d_in)           VMEM
    wqkv_ref: (H, d_in, 3*d_out)     VMEM, per-head columns = [Q | K | V]
    o_ref:    (1, S, H*d_out)        VMEM, heads concatenated along the last dim
    """
    x = x_ref[0]                                   # (S, d_in), native dtype
    w = wqkv_ref[...]                              # (H, d_in, 3*d_out)
    seq, d_in = x.shape

    # Head-batched fused QKV projection: one batched MXU matmul, f32 accumulation.
    xh = jnp.broadcast_to(x[None], (num_heads, seq, d_in))
    qkv = jnp.einsum('hsd,hdo->hso', xh, w,
                     preferred_element_type=jnp.float32).astype(x.dtype)

    q = qkv[..., 0 * d_out:1 * d_out]              # (H, S, d_out)
    k = qkv[..., 1 * d_out:2 * d_out]
    v = qkv[..., 2 * d_out:3 * d_out]

    # QK^T with head as the batch dim -> (H, S, S), f32 accumulation; no keys.T.
    scores = jnp.einsum('hqd,hkd->hqk', q, k,
                        preferred_element_type=jnp.float32)
    scores = scores * (1.0 / (d_out ** 0.5))       # 1/sqrt(d_k) applied in f32

    # Causal mask (True = attend); large finite negative instead of -inf.
    row = lax.broadcasted_iota(jnp.int32, (seq, seq), 0)
    col = lax.broadcasted_iota(jnp.int32, (seq, seq), 1)
    causal = (col <= row)[None]                    # (1, S, S)
    scores = jnp.where(causal, scores, jnp.float32(-1e30))

    # Max-stabilised softmax in f32. Exact normalisation (no approx reciprocal):
    # the approximate EUP reciprocal exceeded the 1e-3 parity tolerance.
    m = jnp.max(scores, axis=-1, keepdims=True)
    e = jnp.exp(scores - m)
    p = e / jnp.sum(e, axis=-1, keepdims=True)

    # TODO(synk): training-mode attention-weight dropout (p > 0) would use
    # pltpu.prng_seed + pltpu.prng_random_bits; the book example uses dropout=0.0
    # (identity), which is what is implemented here.

    # PV with head as the batch dim -> (H, S, d_out), f32 accumulation.
    ctx = jnp.einsum('hqk,hkd->hqd', p.astype(v.dtype), v,
                     preferred_element_type=jnp.float32)

    # Single lane-dense store: (H, S, d_out) -> (S, H*d_out), heads concatenated.
    o_ref[0] = jnp.transpose(ctx, (1, 0, 2)).reshape(
        seq, num_heads * d_out).astype(o_ref.dtype)


def pack_qkv_weights(w_query, w_key, w_value):
    """(H, d_in, d_out) x3 -> (H, d_in, 3*d_out), per-head columns [Q | K | V].

    Done once outside the per-call hot path; the packed weight has a constant
    index_map so it is DMA'd into VMEM a single time per pallas_call.
    """
    return jnp.concatenate([w_query, w_key, w_value], axis=-1)


def multi_head_attention_wrapper(x, w_qkv):
    """Pallas forward for MultiHeadAttentionWrapper (causal, bias-free, dropout=0).

    x:      (B, S, d_in)
    w_qkv:  (H, d_in, 3*d_out)  packed per-head [Q | K | V] weights
    returns (B, S, H*d_out)     heads concatenated on the last dim
    """
    batch, seq, d_in = x.shape
    num_heads = w_qkv.shape[0]
    d_out = w_qkv.shape[-1] // 3
    hd = num_heads * d_out

    kernel = functools.partial(_mha_wrapper_kernel,
                               num_heads=num_heads, d_out=d_out)

    # TODO(synk): for real sequence lengths add flash-style tiling:
    #   grid=(batch, S//tq ["parallel"], S//tk ["arbitrary"]) with m/l/acc VMEM
    #   scratch and pl.when init/finalize, bf16 operands with f32 accumulation,
    #   tq=tk~128-256 on v7x (64 MiB VMEM) and tq up to 512 on v6e/v5e with
    #   vmem_limit_bytes raised. Not emitted at the book's toy shape (S=6, hd=4),
    #   where one full-array block per batch element is optimal.
    return pl.pallas_call(
        kernel,
        out_shape=jax.ShapeDtypeStruct((batch, seq, hd), x.dtype),
        grid=(batch,),
        in_specs=[
            pl.BlockSpec((1, seq, d_in), lambda b: (b, 0, 0)),
            pl.BlockSpec((num_heads, d_in, 3 * d_out), lambda b: (0, 0, 0)),
        ],
        out_specs=pl.BlockSpec((1, seq, hd), lambda b: (b, 0, 0)),
        compiler_params=pltpu.CompilerParams(
            dimension_semantics=("parallel",)),   # batch sharded across TCs on v7x
    )(x, w_qkv)


def multi_head_attention_wrapper_ref(x, w_query, w_key, w_value):
    """Pure-JAX reference mirroring the PyTorch wrapper (dropout in eval / p=0)."""
    _, seq, _ = x.shape
    num_heads, _, d_out = w_query.shape
    upper = jnp.triu(jnp.ones((seq, seq), dtype=bool), k=1)
    hp = jax.lax.Precision.HIGHEST
    outs = []
    for h in range(num_heads):
        q = jnp.einsum('bsd,do->bso', x, w_query[h], precision=hp)
        k = jnp.einsum('bsd,do->bso', x, w_key[h], precision=hp)
        v = jnp.einsum('bsd,do->bso', x, w_value[h], precision=hp)
        scores = jnp.einsum('bqd,bkd->bqk', q, k, precision=hp)
        scores = jnp.where(upper[None], -jnp.inf, scores)
        weights = jax.nn.softmax(scores / (d_out ** 0.5), axis=-1)
        outs.append(jnp.einsum('bqk,bkd->bqd', weights, v, precision=hp))
    return jnp.concatenate(outs, axis=-1)


if __name__ == "__main__":
    # Shapes from the book exercise: batch of 2 copies of the 6x3 token matrix,
    # context_length=6, d_out=2 per head, num_heads=2, dropout=0.0.
    d_in, d_out, num_heads = 3, 2, 2

    inputs = jnp.array(
        [[0.43, 0.15, 0.89],
         [0.55, 0.87, 0.66],
         [0.57, 0.85, 0.64],
         [0.22, 0.58, 0.33],
         [0.77, 0.25, 0.10],
         [0.05, 0.80, 0.55]],
        dtype=jnp.float32,
    )
    x = jnp.stack((inputs, inputs), axis=0)              # (2, 6, 3)

    key = jax.random.PRNGKey(0)
    kq, kk, kv = jax.random.split(key, 3)
    w_query = jax.random.uniform(kq, (num_heads, d_in, d_out), dtype=jnp.float32)
    w_key = jax.random.uniform(kk, (num_heads, d_in, d_out), dtype=jnp.float32)
    w_value = jax.random.uniform(kv, (num_heads, d_in, d_out), dtype=jnp.float32)

    # Pack the per-head projection weights once (outside the hot path).
    w_qkv = pack_qkv_weights(w_query, w_key, w_value)    # (2, 3, 6)

    out = multi_head_attention_wrapper(x, w_qkv)
    out = jax.block_until_ready(out)

    ref = multi_head_attention_wrapper_ref(x, w_query, w_key, w_value)
    assert out.shape == (2, 6, num_heads * d_out), out.shape
    assert jnp.allclose(out, ref, atol=1e-3, rtol=1e-3), (out, ref)

    print("KERNEL_OK")
</pallas_src>

<mosaic_0001>
module attributes {stable_mosaic.version = 11 : i64} {
  func.func @_mha_wrapper_kernel(%arg0: i32, %arg1: memref<1x6x3xf32, #tpu.memory_space<vmem>>, %arg2: memref<2x3x6xf32, #tpu.memory_space<vmem>>, %arg3: memref<1x6x4xf32, #tpu.memory_space<vmem>>) attributes {dimension_semantics = [#tpu.dimension_semantics<parallel>], iteration_bounds = array<i64: 2>, scalar_prefetch = 0 : i64, scratch_operands = 0 : i64, tpu.core_type = #tpu.core_type<tc>, window_params = [{transform_indices = @transform_0, window_bounds = array<i64: 1, 6, 3>}, {pipeline_mode = #tpu.pipeline_mode<synchronous>, transform_indices = @transform_1, window_bounds = array<i64: 2, 3, 6>}, {transform_indices = @transform_2, window_bounds = array<i64: 1, 6, 4>}]} {
    %c0 = arith.constant 0 : index
    %c0_0 = arith.constant 0 : index
    %c0_1 = arith.constant 0 : index
    %0 = vector.load %arg1[%c0, %c0_0, %c0_1] : memref<1x6x3xf32, #tpu.memory_space<vmem>>, vector<1x6x3xf32>
    %1 = vector.shape_cast %0 : vector<1x6x3xf32> to vector<6x3xf32>
    %c0_2 = arith.constant 0 : index
    %c0_3 = arith.constant 0 : index
    %c0_4 = arith.constant 0 : index
    %2 = vector.load %arg2[%c0_2, %c0_3, %c0_4] : memref<2x3x6xf32, #tpu.memory_space<vmem>>, vector<2x3x6xf32>
    %3 = vector.shape_cast %1 : vector<6x3xf32> to vector<1x6x3xf32>
    %4 = vector.shape_cast %3 : vector<1x6x3xf32> to vector<1x6x3xf32>
    %5 = vector.broadcast %4 : vector<1x6x3xf32> to vector<2x6x3xf32>
    "tpu.trace_start"() <{level = 10 : i32, message = "hsd,hdo->hso"}> : () -> ()
    %cst = arith.constant dense<0.000000e+00> : vector<2x6x6xf32>
    %6 = tpu.matmul %5, %2, %cst {dimension_numbers = #tpu.dot_dimension_numbers<[2], [1], [1], [2], [0, 0, 0, 1, 1, 2], [0], [0]>} : vector<2x6x3xf32>, vector<2x3x6xf32>, vector<2x6x6xf32> -> vector<2x6x6xf32>
    "tpu.trace_stop"() : () -> ()
    %7 = vector.extract_strided_slice %6 {offsets = [0, 0, 0], sizes = [2, 6, 2], strides = [1, 1, 1]} : vector<2x6x6xf32> to vector<2x6x2xf32>
    %8 = vector.extract_strided_slice %6 {offsets = [0, 0, 2], sizes = [2, 6, 2], strides = [1, 1, 1]} : vector<2x6x6xf32> to vector<2x6x2xf32>
    %9 = vector.extract_strided_slice %6 {offsets = [0, 0, 4], sizes = [2, 6, 2], strides = [1, 1, 1]} : vector<2x6x6xf32> to vector<2x6x2xf32>
    "tpu.trace_start"() <{level = 10 : i32, message = "hqd,hkd->hqk"}> : () -> ()
    %cst_5 = arith.constant dense<0.000000e+00> : vector<2x6x6xf32>
    %10 = tpu.matmul %7, %8, %cst_5 {dimension_numbers = #tpu.dot_dimension_numbers<[2], [2], [1], [1], [0, 0, 0, 1, 1, 1], [0], [0]>} : vector<2x6x2xf32>, vector<2x6x2xf32>, vector<2x6x6xf32> -> vector<2x6x6xf32>
    "tpu.trace_stop"() : () -> ()
    %cst_6 = arith.constant 0.707106769 : f32
    %11 = vector.broadcast %cst_6 : f32 to vector<2x6x6xf32>
    %12 = arith.mulf %10, %11 : vector<2x6x6xf32>
    %13 = tpu.iota {dimensions = array<i32: 0>} : vector<6x6xi32>
    %14 = tpu.iota {dimensions = array<i32: 1>} : vector<6x6xi32>
    %15 = arith.cmpi sle, %14, %13 : vector<6x6xi32>
    %16 = vector.shape_cast %15 : vector<6x6xi1> to vector<1x6x6xi1>
    %cst_7 = arith.constant -1.000000e+30 : f32
    %17 = vector.shape_cast %16 : vector<1x6x6xi1> to vector<1x6x6xi1>
    %18 = vector.broadcast %17 : vector<1x6x6xi1> to vector<2x6x6xi1>
    %19 = vector.broadcast %cst_7 : f32 to vector<2x6x6xf32>
    %20 = arith.select %18, %12, %19 : vector<2x6x6xi1>, vector<2x6x6xf32>
    %cst_8 = arith.constant dense<0xFF800000> : vector<2x6xf32>
    %21 = vector.multi_reduction <maximumf>, %20, %cst_8 [2] : vector<2x6x6xf32> to vector<2x6xf32>
    %22 = vector.shape_cast %21 : vector<2x6xf32> to vector<2x6x1xf32>
    %23 = vector.broadcast %22 : vector<2x6x1xf32> to vector<2x6x6xf32>
    %24 = arith.subf %20, %23 : vector<2x6x6xf32>
    %25 = math.exp %24 : vector<2x6x6xf32>
    %cst_9 = arith.constant dense<0.000000e+00> : vector<2x6xf32>
    %26 = vector.multi_reduction <add>, %25, %cst_9 [2] : vector<2x6x6xf32> to vector<2x6xf32>
    %27 = vector.shape_cast %26 : vector<2x6xf32> to vector<2x6x1xf32>
    %28 = vector.broadcast %27 : vector<2x6x1xf32> to vector<2x6x6xf32>
    %29 = arith.divf %25, %28 : vector<2x6x6xf32>
    "tpu.trace_start"() <{level = 10 : i32, message = "hqk,hkd->hqd"}> : () -> ()
    %cst_10 = arith.constant dense<0.000000e+00> : vector<2x6x2xf32>
    %30 = tpu.matmul %29, %9, %cst_10 {dimension_numbers = #tpu.dot_dimension_numbers<[2], [1], [1], [2], [0, 0, 0, 1, 1, 2], [0], [0]>} : vector<2x6x6xf32>, vector<2x6x2xf32>, vector<2x6x2xf32> -> vector<2x6x2xf32>
    "tpu.trace_stop"() : () -> ()
    %31 = tpu.transpose %30, [1, 0, 2] : vector<2x6x2xf32> -> vector<6x2x2xf32>
    %32 = vector.shape_cast %31 : vector<6x2x2xf32> to vector<6x4xf32>
    %c0_11 = arith.constant 0 : index
    %c0_12 = arith.constant 0 : index
    %c0_13 = arith.constant 0 : index
    %33 = vector.load %arg3[%c0_11, %c0_12, %c0_13] : memref<1x6x4xf32, #tpu.memory_space<vmem>>, vector<1x6x4xf32>
    %34 = vector.shape_cast %33 : vector<1x6x4xf32> to vector<6x4xf32>
    %35 = vector.shape_cast %32 : vector<6x4xf32> to vector<1x6x4xf32>
    tpu.vector_store %arg3[%c0_11, %c0_12, %c0_13], %35 {strides = array<i32>} : memref<1x6x4xf32, #tpu.memory_space<vmem>>, vector<1x6x4xf32>,
    return
  }
  func.func @transform_0(%arg0: i32) -> (i32, i32, i32) {
    %c0_i32 = arith.constant 0 : i32
    %c0_i32_0 = arith.constant 0 : i32
    %c0_i32_1 = arith.constant 0 : i32
    return %arg0, %c0_i32, %c0_i32_0 : i32, i32, i32
  }
  func.func @transform_1(%arg0: i32) -> (i32, i32, i32) {
    %c0_i32 = arith.constant 0 : i32
    %c0_i32_0 = arith.constant 0 : i32
    %c0_i32_1 = arith.constant 0 : i32
    %c0_i32_2 = arith.constant 0 : i32
    return %c0_i32, %c0_i32_0, %c0_i32_1 : i32, i32, i32
  }
  func.func @transform_2(%arg0: i32) -> (i32, i32, i32) {
    %c0_i32 = arith.constant 0 : i32
    %c0_i32_0 = arith.constant 0 : i32
    %c0_i32_1 = arith.constant 0 : i32
    return %arg0, %c0_i32, %c0_i32_0 : i32, i32, i32
  }
}

</mosaic_0001>

<bundles_post_ra>
// kernel: tpu_custom_call.1
= control target key start
LH: loop header
LB: loop body
LE: loop exit
PB: predicated region body
PF: predicated region fallthrough
CT: control target
= control target key end

     0   :  { %s893_s9 = smov 0   ;;  %s953_s0 = inlined_call_operand.vmem [shape: f32[2,6,3], index: 0, kind: input, shape index: {}]   ;;  %s954_s1 = inlined_call_operand.vmem [shape: f32[2,3,6], index: 1, kind: input, shape index: {}]   ;;  %s955_s2 = inlined_call_operand.vmem [shape: f32[2,6,4], index: 2, kind: output, shape index: {}]  }
   0x1 LB: > { %s775_s10 = sadd.s32 4294967295, %s869_s9   ;;  %p779_p0 = scmp.ge.s32.totalorder %s869_s9, 1  ;;  %s869_s9 = sphi %s893_s9, %s12_s9  }
   0x2   : > { %p111_p1 = scmp.lt.s32.totalorder %s869_s9, 3 }
   0x4   : > { %p112_p2 = pnand %p779_p0, %p111_p1 }
   0x5   : > { %p131_p3 = scmp.lt.s32.totalorder (!%p112_p2), %s775_s10, 1  ;;  %s873_s19 = smov (!%p112_p2), 126  }
   0x6   : > { %115 = sbr.rel (%p112_p2) target bundleno = 1165 (0x48d), region = 28  ;;  %s874_s20 = smov (!%p112_p2), 124  }
   0x7   : > { %s877_s21 = smov (!%p112_p2), 2  }
   0xb   : > { %v140_v0 = vld [vmem:[%s954_s1] sm:$0x7]  ;;  %vm146_vm0 = vcmask 1042432   ;;  %v871_v1 = vmov 0.0   ;;  %vm872_vm1 = vmmov 0   ;;  %s957_s10 = smov (!%p131_p3, %s775_s10), 1  ;;  %v450_v10 = vlaneseq }
   0xc   : > { %810 = vmatprep.subr.mxu0 %v871_v1  ;;  %812 = vmatprep.mubr.msk.f32.mxu0 %vm872_vm1, %v871_v1  ;;  %v141_v2 = vld [vmem:[%s954_s1 + $0x4] sm:$0x7]  ;;  %s780_s15 = sshll.u32 %s957_s10, 3  ;;  %vm142_vm2 = vcmask 23552   ;;  %vm296_vm3 = vcmask 15360   ;;  %vm459_vm5 = vcmask 46080  }
   0xd   : > { %811 = vmatpush3.msk.msra.mxu0 %vm146_vm0, %v140_v0  ;;  %815 = vmatprep.subr.mxu1 %v871_v1  ;;  %s134_s18 = scalar_lea.vmem %s953_s0, %s780_s15  ;;  %v451_v11 = vshrl.u32 %v450_v10, 7  ;;  %v453_v12 = vand.u32 127, %v450_v10  ;;  %vm488_vm6 = vcmask 1045504   ;;  %vm484_vm7 = vcmask 48128   ;;  %s138_s24 = scalar_lea.vmem %s955_s2, %s780_s15 }
   0xe   : > { %816 = vmatpush3.msk.msra.mxu1 %vm146_vm0, %v141_v2  ;;  %817 = vmatprep.mubr.msk.f32.mxu1 %vm872_vm1, %v871_v1  ;;  %v139_v3 = vld [vmem:[%s134_s18] sm:$0x3f]  ;;  %v875_v41 = vmov 1983009808   ;;  %v876_v43 = vmov 1934713408  }
   0xf   : > { %820 = vmatprep.subr.mxu0 %v871_v1  ;;  %825 = vmatprep.subr.mxu1 %v871_v1  ;;  %vm454_vm4 = vcmp.le.s32.totalorder %v453_v12, %v451_v11  ;;  %v639_v42 = vunpack.c.l.s4 %v875_v41  ;;  %v657_v44 = vunpack.c.l.s4 %v876_v43  ;;  %vm720_vm8 = vcmask 29696  }
  0x10   : > { %813 = vmatmul.mubr.msk.f32.vlgmr.msra.gmra.mxu0 %vm142_vm2, %v139_v3  ;;  %818 = vmatmul.mubr.msk.f32.vlgmr.msra.gmra.mxu1 %vm142_vm2, %v139_v3 }
  0x11   : > { %822 = vmatprep.mubr.msk.f32.mxu0 %vm872_vm1, %v871_v1  ;;  %827 = vmatprep.mubr.msk.f32.mxu1 %vm872_vm1, %v871_v1  ;;  %v640_v45 = vunpack.c.0.s8 %v639_v42  ;;  %v658_v46 = vunpack.c.0.s8 %v657_v44 }
  0x13   : > { %v643_v48 = vsub.s32 %v640_v45, %v451_v11  ;;  %v661_v50 = vsub.s32 %v658_v46, %v451_v11 }
  0xd0   : > { %v216_v4 = vpop.f32.mrf.mxu0  ;;  %v289_v5 = vpop.f32.mrf.mxu1 }
  0xd1   : > { %294 = vrot.lane.b32.xlu0 %v216_v4, %s873_s19 }
  0xd2   : > { %v814_v6 = vpop.f32.mrf.mxu0  ;;  %v819_v7 = vpop.f32.mrf.mxu1 }
  0xd5   : > { %372 = vrot.lane.b32.xlu0 %v289_v5, %s873_s19 }
 0x143   : > { %v295_v8 = vpop.permute.xlu0 %294 }
 0x144   : > { %821 = vmatpush3.xpose.msk.msra.mxu0 %vm296_vm3, %v295_v8 }
 0x145   : > { %830 = vmatprep.subr.mxu0 %v871_v1 }
 0x147   : > { %823 = vmatmul.mubr.msk.f32.vlgmr.msra.gmra.mxu0 %vm296_vm3, %v216_v4  ;;  %v373_v9 = vpop.permute.xlu0 %372 }
 0x148   : > { %826 = vmatpush3.xpose.msk.msra.mxu1 %vm296_vm3, %v373_v9  ;;  %832 = vmatprep.mubr.msk.f32.mxu0 %vm872_vm1, %v871_v1 }
 0x149   : > { %835 = vmatprep.subr.mxu1 %v871_v1 }
 0x14b   : > { %828 = vmatmul.mubr.msk.f32.vlgmr.msra.gmra.mxu1 %vm296_vm3, %v289_v5 }
 0x14c   : > { %837 = vmatprep.mubr.msk.f32.mxu1 %vm872_vm1, %v871_v1 }
 0x207   : > { %v367_v13 = vpop.f32.mrf.mxu0 }
 0x208   : > { %v448_v14 = vmul.f32 0.70710677, %v367_v13 }
 0x209   : > { %v824_v15 = vpop.f32.mrf.mxu0 }
 0x20a   : > { %v457_v16 = vsel %vm454_vm4, %v448_v14, -1e+30 }
 0x20b   : > { %v444_v17 = vpop.f32.mrf.mxu1  ;;  %v460_v18 = vsel %vm459_vm5, %v457_v16, -inf }
 0x20c   : > { %v449_v19 = vmul.f32 0.70710677, %v444_v17  ;;  %461 = vmax.xlane.f32.xlu1 %v460_v18 }
 0x20d   : > { %v829_v20 = vpop.f32.mrf.mxu1 }
 0x20e   : > { %v458_v21 = vsel %vm454_vm4, %v449_v19, -1e+30 }
 0x20f   : > { %v463_v22 = vsel %vm459_vm5, %v458_v21, -inf }
 0x210   : > { %464 = vmax.xlane.f32.xlu1 %v463_v22 }
 0x221   : > { %482 = vrot.lane.b32.xlu1 %v216_v4, %s874_s20 }
 0x295   : > { %v462_v23 = vpop.xlane.xlu1 %461 }
 0x296   : > { %v466_v24 = vsub.f32 %v457_v16, %v462_v23 }
 0x298   : > { %v468_v25 = vmul.f32 1.442695, %v466_v24 }
 0x299   : > { %v465_v26 = vpop.xlane.xlu1 %464 }
 0x29a   : > { %855 = vpow2.f32 %v468_v25  ;;  %v467_v27 = vsub.f32 %v458_v21, %v465_v26 }
 0x29c   : > { %v470_v28 = vmul.f32 1.442695, %v467_v27 }
 0x29d   : > { %v483_v29 = vpop.permute.xlu1 %482 }
 0x29e   : > { %857 = vpow2.f32 %v470_v28  ;;  %831 = vmatpush3.msk.msra.mxu0 %vm488_vm6, %v483_v29 }
 0x2a7   : > { %v856_v30 = vpop.eup %855 }
 0x2a8   : > { %v472_v31 = vsel %vm459_vm5, %v856_v30, 0.0 }
 0x2a9   : > { %473 = vadd.xlane.f32.xlu0 %v472_v31 }
 0x2ab   : > { %v858_v32 = vpop.eup %857 }
 0x2ac   : > { %v475_v33 = vsel %vm459_vm5, %v858_v32, 0.0 }
 0x2ad   : > { %476 = vadd.xlane.f32.xlu1 %v475_v33 }
 0x2be   : > { %561 = vrot.lane.b32.xlu1 %v289_v5, %s874_s20 }
 0x332   : > { %v474_v34 = vpop.xlane.xlu0 %473 }
 0x333   : > { %859 = vrcp.f32 %v474_v34 }
 0x336   : > { %v477_v35 = vpop.xlane.xlu1 %476 }
 0x337   : > { %861 = vrcp.f32 %v477_v35 }
 0x33a   : > { %v562_v36 = vpop.permute.xlu1 %561 }
 0x33b   : > { %836 = vmatpush3.msk.msra.mxu1 %vm488_vm6, %v562_v36 }
 0x340   : > { %v860_v37 = vpop.eup %859 }
 0x341   : > { %v479_v38 = vmul.f32 %v860_v37, %v856_v30 }
 0x343   : > { %833 = vmatmul.mubr.msk.f32.vlgmr.msra.gmra.mxu0 %vm484_vm7, %v479_v38 }
 0x344   : > { %v862_v39 = vpop.eup %861 }
 0x345   : > { %v481_v40 = vmul.f32 %v862_v39, %v858_v32 }
 0x347   : > { %838 = vmatmul.mubr.msk.f32.vlgmr.msra.gmra.mxu1 %vm484_vm7, %v481_v40 }
 0x403   : > { %v557_v47 = vpop.f32.mrf.mxu0 }
 0x404   : > { %v644_v52 = vrot.slane %v557_v47, %v643_v48 }
 0x405   : > { %v834_v49 = vpop.f32.mrf.mxu0 }
 0x407   : > { %v634_v51 = vpop.f32.mrf.mxu1 }
 0x408   : > { %v652_v53 = vrot.slane %v634_v51, %v643_v48  ;;  %v794_v54 = vcombine.high %v557_v47, %v634_v51 }
 0x409   : > { %v839_v55 = vpop.f32.mrf.mxu1 }
 0x40a   : > { %v654_v56 = vcombine.low %v644_v52, %v652_v53  ;;  %v655_v57 = vcombine.high %v644_v52, %v652_v53  ;;  %v677_v58 = vrot.slane %v794_v54, %v661_v50 }
 0x40c   : > { %v662_v59 = vrot.slane %v654_v56, %v661_v50  ;;  %v669_v60 = vrot.slane %v655_v57, %v661_v50  ;;  %v696_v61 = vcombine.high %v677_v58, %v871_v1 }
 0x40e   : > { %v680_v62 = vcombine.low %v662_v59, %v669_v60  ;;  %v795_v63 = vcombine.high %v662_v59, %v669_v60  ;;  %v705_v3 = vcombine.low %v677_v58, %v696_v61 }
 0x410   : > { %v687_v0 = vrot.slane %v680_v62, %v643_v48  ;;  %v695_v2 = vrot.slane %v795_v63, %v643_v48  ;;  %v712_v6 = vrot.slane %v705_v3, %v661_v50 }
 0x412   : > { %v697_v4 = vcombine.low %v687_v0, %v695_v2 }
 0x414   : > { %v704_v5 = vrot.slane %v697_v4, %v661_v50 }
 0x416   : > { %v714_v7 = vcombine.high %v704_v5, %v712_v6  ;;  %v713_v8 = vcombine.low %v704_v5, %v712_v6 }
 0x418   : > { %716 = vrot.lane.b32.xlu1 %v714_v7, %s877_s21 }
 0x48a   : > { %v717_v9 = vpop.permute.xlu1 %716 }
 0x48b   : > { %v719_v1 = vsel %vm296_vm3, %v713_v8, %v717_v9 }
 0x48c   : > { %721 = vst.msk [vmem:[%s138_s24] sm:$0x3f] %vm720_vm8, %v719_v1 }
 0x48d PF: > { %s12_s9 = sadd.s32 1, %s869_s9  }
 0x48e   : > { %p9_p4 = scmp.ge.s32.totalorder %s12_s9, 4  }
 0x490   :  { %11 = sbr.rel (!%p9_p4) target bundleno = 1 (0x1), region = 58 }

</bundles_post_ra>
